<compile_context>
chip_gen: v6e
topology: v6e:2x2x1
jax: 0.10.0
libtpu: 0.0.40
codegen_flags: <defaults>
</compile_context>

<pallas_src>
import functools

import jax
import jax.numpy as jnp
from jax.experimental import pallas as pl
from jax.experimental.pallas import tpu as pltpu


def _concat_kernel(e1_ref, e2_ref, w1_ref, w2_ref, b_ref, out_ref):
    # cat([e1, e2], -1) @ W.T == e1 @ W1 + e2 @ W2 with W1/W2 = W[:, :D].T, W[:, D:].T
    logits = (
        jnp.dot(e1_ref[...], w1_ref[...], preferred_element_type=jnp.float32)
        + jnp.dot(e2_ref[...], w2_ref[...], preferred_element_type=jnp.float32)
    )
    out_ref[...] = (logits + b_ref[...]).astype(out_ref.dtype)


def _fused_kernel(e1_ref, e2_ref, w_ref, b_ref, out_ref, *, strategy):
    e1 = e1_ref[...]
    e2 = e2_ref[...]
    if strategy == "avg":
        fused = (e1 + e2) * jnp.asarray(0.5, dtype=e1.dtype)
    else:  # "max"
        fused = jnp.maximum(e1, e2)
    logits = jnp.dot(fused, w_ref[...], preferred_element_type=jnp.float32)
    out_ref[...] = (logits + b_ref[...]).astype(out_ref.dtype)


def _round_up(x, m):
    return (x + m - 1) // m * m


def _vmem_capacity_bytes():
    try:
        return int(pltpu.get_tpu_info().vmem_capacity_bytes)
    except Exception:
        return 64 << 20  # conservative fallback (v7x per-TC VMEM)


def _choose_batch_tile(B, D, itemsize):
    """Pick the batch tile TB (rows) for the streamed embedding blocks."""
    # Generation-aware live-VMEM budget: ~half of physical VMEM
    # (~32 MiB on v7x, ~64 MiB on v5e/v6e), leaving headroom for Mosaic.
    live_budget = min(_vmem_capacity_bytes() // 2, 64 << 20)
    # 2 embedding inputs x 2 pipeline buffers dominate the live footprint.
    max_block_bytes = max(live_budget // 4, 1)
    # Mem-bound sweet spot: ~2 MiB per embedding block.
    block_bytes = min(2 << 20, max_block_bytes)
    tb = max(block_bytes // max(D * itemsize, 1), 8)
    # Keep >= 2 grid steps so v7x's two TensorCores can both be used
    # (no-op cost on single-core v5e/v6e).
    b8 = _round_up(max(B, 1), 8)
    tb = min(tb, max(b8 // 2, 8))
    if tb >= B:
        # Single block covering the full batch: block dim equals the array dim,
        # so the (8, 128) tiling rule is satisfied even for tiny/odd B.
        return B
    return max(8, (tb // 8) * 8)


def late_fusion_forward(e1, e2, weight, bias, *, strategy="concat",
                        compute_dtype=jnp.bfloat16):
    """Forward pass of LateFusionModel.

    e1, e2 : [B, D] embeddings
    weight : [2, D_in] (PyTorch nn.Linear layout); D_in = 2*D for concat, D otherwise
    bias   : [2]
    returns: [B, 2] logits (dtype of e1)

    compute_dtype: streaming dtype for embeddings/weights (default bf16,
    f32 MXU accumulation).  Pass None for exact f32 streaming.
    """
    B, D = e1.shape
    out_dtype = e1.dtype
    if compute_dtype is not None and jnp.dtype(compute_dtype) != e1.dtype:
        e1 = e1.astype(compute_dtype)
        e2 = e2.astype(compute_dtype)
        weight = weight.astype(compute_dtype)

    itemsize = jnp.dtype(e1.dtype).itemsize
    out_itemsize = jnp.dtype(out_dtype).itemsize

    TB = _choose_batch_tile(B, D, itemsize)
    grid = (pl.cdiv(B, TB),)

    emb_spec = pl.BlockSpec((TB, D), lambda i: (i, 0))
    w_spec = pl.BlockSpec((D, 2), lambda i: (0, 0))    # resident across grid
    b_spec = pl.BlockSpec((1, 2), lambda i: (0, 0))    # resident across grid
    out_spec = pl.BlockSpec((TB, 2), lambda i: (i, 0))

    b2 = bias.reshape(1, 2).astype(jnp.float32)

    if strategy == "concat":
        assert weight.shape == (2, 2 * D)
        # One-time host-side transpose to MXU-friendly [D, 2] halves.
        w1 = jnp.transpose(weight[:, :D])
        w2 = jnp.transpose(weight[:, D:])
        kernel = _concat_kernel
        args = (e1, e2, w1, w2, b2)
        in_specs = [emb_spec, emb_spec, w_spec, w_spec, b_spec]
        d_in = 2 * D
        w_bytes = 2 * 2 * D * itemsize
    elif strategy in ("avg", "max"):
        assert weight.shape == (2, D)
        wT = jnp.transpose(weight)
        kernel = functools.partial(_fused_kernel, strategy=strategy)
        args = (e1, e2, wT, b2)
        in_specs = [emb_spec, emb_spec, w_spec, b_spec]
        d_in = D
        w_bytes = 2 * D * itemsize
    else:
        raise ValueError(
            "Invalid fusion strategy. Choose from ['concat', 'avg', 'max']")

    # Explicit VMEM limit: 2 streamed inputs x 2 buffers + output x 2 buffers
    # + weights/bias (x2 buffers), with generous headroom for Mosaic scratch.
    emb_block_bytes = TB * D * itemsize
    out_block_bytes = TB * 2 * out_itemsize
    vmem_needed = (2 * 2 * emb_block_bytes
                   + 2 * out_block_bytes
                   + 2 * (w_bytes + 2 * 4))
    vmem_cap = _vmem_capacity_bytes()
    vmem_limit = int(min(max(2 * vmem_needed + (2 << 20), 16 << 20),
                         vmem_cap - (16 << 20)))

    cost = pl.CostEstimate(
        flops=2 * B * d_in * 2,
        transcendentals=0,
        bytes_accessed=(2 * B * D * itemsize          # e1, e2 reads
                        + w_bytes + 2 * 4             # weights + bias
                        + B * 2 * out_itemsize),      # output
    )

    return pl.pallas_call(
        kernel,
        out_shape=jax.ShapeDtypeStruct((B, 2), out_dtype),
        grid=grid,
        in_specs=in_specs,
        out_specs=out_spec,
        compiler_params=pltpu.CompilerParams(
            dimension_semantics=("parallel",),
            vmem_limit_bytes=vmem_limit,
        ),
        cost_estimate=cost,
    )(*args)


def _reference(e1, e2, weight, bias, strategy):
    if strategy == "concat":
        fused = jnp.concatenate([e1, e2], axis=-1)
    elif strategy == "avg":
        fused = (e1 + e2) / 2
    else:
        fused = jnp.maximum(e1, e2)
    return fused @ weight.T + bias


if __name__ == "__main__":
    key = jax.random.PRNGKey(0)
    D = 128  # module default embedding_dim

    k1, k2, kw_c, kb_c, kw_s, kb_s = jax.random.split(key, 6)

    # nn.Linear-style parameters (PyTorch layout: [out_features, in_features]).
    w_concat = jax.random.normal(kw_c, (2, 2 * D), dtype=jnp.float32) * 0.05
    b_concat = jax.random.normal(kb_c, (2,), dtype=jnp.float32) * 0.05
    w_single = jax.random.normal(kw_s, (2, D), dtype=jnp.float32) * 0.05
    b_single = jax.random.normal(kb_s, (2,), dtype=jnp.float32) * 0.05

    params = {
        "concat": (w_concat, b_concat),
        "avg": (w_single, b_single),
        "max": (w_single, b_single),
    }

    ok = True
    # B=16 -> multi-step grid; B=52 -> exercises a partial (edge) batch block.
    for B in (16, 52):
        e1 = jax.random.normal(k1, (B, D), dtype=jnp.float32)
        e2 = jax.random.normal(k2, (B, D), dtype=jnp.float32)
        for strategy, (w, b) in params.items():
            ref = _reference(e1, e2, w, b, strategy)

            # Exact f32 streaming path.
            out_f32 = jax.block_until_ready(
                late_fusion_forward(e1, e2, w, b, strategy=strategy,
                                    compute_dtype=None))
            if out_f32.shape != ref.shape or not jnp.allclose(
                    out_f32, ref, atol=1e-5, rtol=1e-5):
                ok = False
                print(f"MISMATCH (f32) strategy={strategy} B={B}")

            # Default bf16 streaming path (f32 accumulation): looser tolerance.
            out_bf16 = jax.block_until_ready(
                late_fusion_forward(e1, e2, w, b, strategy=strategy))
            if out_bf16.shape != ref.shape or not jnp.allclose(
                    out_bf16, ref, atol=5e-2, rtol=5e-2):
                ok = False
                print(f"MISMATCH (bf16) strategy={strategy} B={B}")

    if ok:
        print("KERNEL_OK")
</pallas_src>

<mosaic_0001>
module attributes {stable_mosaic.version = 11 : i64} {
  func.func @_concat_kernel(%arg0: i32, %arg1: memref<8x128xf32, #tpu.memory_space<vmem>>, %arg2: memref<8x128xf32, #tpu.memory_space<vmem>>, %arg3: memref<128x2xf32, #tpu.memory_space<vmem>>, %arg4: memref<128x2xf32, #tpu.memory_space<vmem>>, %arg5: memref<1x2xf32, #tpu.memory_space<vmem>>, %arg6: memref<8x2xf32, #tpu.memory_space<vmem>>) attributes {dimension_semantics = [#tpu.dimension_semantics<parallel>], iteration_bounds = array<i64: 2>, scalar_prefetch = 0 : i64, scratch_operands = 0 : i64, tpu.core_type = #tpu.core_type<tc>, window_params = [{transform_indices = @transform_0, window_bounds = array<i64: 8, 128>}, {transform_indices = @transform_1, window_bounds = array<i64: 8, 128>}, {pipeline_mode = #tpu.pipeline_mode<synchronous>, transform_indices = @transform_2, window_bounds = array<i64: 128, 2>}, {pipeline_mode = #tpu.pipeline_mode<synchronous>, transform_indices = @transform_3, window_bounds = array<i64: 128, 2>}, {pipeline_mode = #tpu.pipeline_mode<synchronous>, transform_indices = @transform_4, window_bounds = array<i64: 1, 2>}, {transform_indices = @transform_5, window_bounds = array<i64: 8, 2>}]} {
    %c0 = arith.constant 0 : index
    %c0_0 = arith.constant 0 : index
    %0 = vector.load %arg1[%c0, %c0_0] : memref<8x128xf32, #tpu.memory_space<vmem>>, vector<8x128xf32>
    %c0_1 = arith.constant 0 : index
    %c0_2 = arith.constant 0 : index
    %1 = vector.load %arg3[%c0_1, %c0_2] : memref<128x2xf32, #tpu.memory_space<vmem>>, vector<128x2xf32>
    %cst = arith.constant dense<0.000000e+00> : vector<8x2xf32>
    %2 = tpu.matmul %0, %1, %cst {dimension_numbers = #tpu.dot_dimension_numbers<[1], [0], [0], [1], [0, 0, 1, 1], [], []>} : vector<8x128xf32>, vector<128x2xf32>, vector<8x2xf32> -> vector<8x2xf32>
    %c0_3 = arith.constant 0 : index
    %c0_4 = arith.constant 0 : index
    %3 = vector.load %arg2[%c0_3, %c0_4] : memref<8x128xf32, #tpu.memory_space<vmem>>, vector<8x128xf32>
    %c0_5 = arith.constant 0 : index
    %c0_6 = arith.constant 0 : index
    %4 = vector.load %arg4[%c0_5, %c0_6] : memref<128x2xf32, #tpu.memory_space<vmem>>, vector<128x2xf32>
    %cst_7 = arith.constant dense<0.000000e+00> : vector<8x2xf32>
    %5 = tpu.matmul %3, %4, %cst_7 {dimension_numbers = #tpu.dot_dimension_numbers<[1], [0], [0], [1], [0, 0, 1, 1], [], []>} : vector<8x128xf32>, vector<128x2xf32>, vector<8x2xf32> -> vector<8x2xf32>
    %6 = arith.addf %2, %5 : vector<8x2xf32>
    %c0_8 = arith.constant 0 : index
    %c0_9 = arith.constant 0 : index
    %7 = vector.load %arg5[%c0_8, %c0_9] : memref<1x2xf32, #tpu.memory_space<vmem>>, vector<1x2xf32>
    %8 = vector.broadcast %7 : vector<1x2xf32> to vector<8x2xf32>
    %9 = arith.addf %6, %8 : vector<8x2xf32>
    %c0_10 = arith.constant 0 : index
    %c0_11 = arith.constant 0 : index
    %10 = vector.load %arg6[%c0_10, %c0_11] : memref<8x2xf32, #tpu.memory_space<vmem>>, vector<8x2xf32>
    tpu.vector_store %arg6[%c0_10, %c0_11], %9 {strides = array<i32>} : memref<8x2xf32, #tpu.memory_space<vmem>>, vector<8x2xf32>,
    return
  }
  func.func @transform_0(%arg0: i32) -> (i32, i32) {
    %c0_i32 = arith.constant 0 : i32
    %c0_i32_0 = arith.constant 0 : i32
    return %arg0, %c0_i32 : i32, i32
  }
  func.func @transform_1(%arg0: i32) -> (i32, i32) {
    %c0_i32 = arith.constant 0 : i32
    %c0_i32_0 = arith.constant 0 : i32
    return %arg0, %c0_i32 : i32, i32
  }
  func.func @transform_2(%arg0: i32) -> (i32, i32) {
    %c0_i32 = arith.constant 0 : i32
    %c0_i32_0 = arith.constant 0 : i32
    %c0_i32_1 = arith.constant 0 : i32
    return %c0_i32, %c0_i32_0 : i32, i32
  }
  func.func @transform_3(%arg0: i32) -> (i32, i32) {
    %c0_i32 = arith.constant 0 : i32
    %c0_i32_0 = arith.constant 0 : i32
    %c0_i32_1 = arith.constant 0 : i32
    return %c0_i32, %c0_i32_0 : i32, i32
  }
  func.func @transform_4(%arg0: i32) -> (i32, i32) {
    %c0_i32 = arith.constant 0 : i32
    %c0_i32_0 = arith.constant 0 : i32
    %c0_i32_1 = arith.constant 0 : i32
    return %c0_i32, %c0_i32_0 : i32, i32
  }
  func.func @transform_5(%arg0: i32) -> (i32, i32) {
    %c0_i32 = arith.constant 0 : i32
    %c0_i32_0 = arith.constant 0 : i32
    return %arg0, %c0_i32 : i32, i32
  }
}

</mosaic_0001>

<bundles_post_ra>
// kernel: tpu_custom_call.1
= control target key start
LH: loop header
LB: loop body
LE: loop exit
PB: predicated region body
PF: predicated region fallthrough
CT: control target
= control target key end

     0   :  { %s651_s18 = smov 0   ;;  %s813_s0 = inlined_call_operand.vmem [shape: f32[16,128], index: 0, kind: input, shape index: {}]   ;;  %s814_s1 = inlined_call_operand.vmem [shape: f32[16,128], index: 1, kind: input, shape index: {}]   ;;  %s815_s2 = inlined_call_operand.vmem [shape: f32[128,2], index: 2, kind: input, shape index: {}]   ;;  %s816_s3 = inlined_call_operand.vmem [shape: f32[128,2], index: 3, kind: input, shape index: {}]   ;;  %s817_s4 = inlined_call_operand.vmem [shape: f32[1,2], index: 4, kind: input, shape index: {}]   ;;  %s818_s5 = inlined_call_operand.vmem [shape: f32[16,2], index: 5, kind: output, shape index: {}]  }
   0x1 LB: > { %s486_s19 = sadd.s32 4294967295, %s617_s18   ;;  %p490_p0 = scmp.ge.s32.totalorder %s617_s18, 1  ;;  %s617_s18 = sphi %s651_s18, %s15_s18  }
   0x2   : > { %p195_p1 = scmp.lt.s32.totalorder %s617_s18, 3 }
   0x4   : > { %p196_p2 = pnand %p490_p0, %p195_p1 }
   0x5   : > { %p225_p3 = scmp.lt.s32.totalorder (!%p196_p2), %s486_s19, 1 }
   0x6   : > { %199 = sbr.rel (%p196_p2) target bundleno = 243 (0xf3), region = 40 }
   0xb   : > { %v270_v0 = vld [vmem:[%s816_s3 + $0x78] sm:$0xff]  ;;  %v619_v2 = vmov 0.0   ;;  %v269_v3 = vld [vmem:[%s816_s3 + $0x70] sm:$0xff]  ;;  %v268_v5 = vld [vmem:[%s816_s3 + $0x68] sm:$0xff]  ;;  %s820_s19 = smov (!%p225_p3, %s486_s19), 1  ;;  %vm620_vm0 = vmmov 0  }
   0xc   : > { %v253_v1 = vld [vmem:[%s815_s2 + $0x78] sm:$0xff]  ;;  %531 = vmatprep.subr.mxu0 %v619_v2  ;;  %566 = vmatprep.subr.mxu1 %v619_v2  ;;  %v252_v4 = vld [vmem:[%s815_s2 + $0x70] sm:$0xff]  ;;  %v251_v6 = vld [vmem:[%s815_s2 + $0x68] sm:$0xff]  ;;  %s773_s30 = sshll.u32 %s820_s19, 3  ;;  %vm419_vm1 = vcmask 15360  }
   0xd   : > { %532 = vmatpush3.msra.mxu0 %v270_v0  ;;  %567 = vmatpush3.msra.mxu1 %v253_v1  ;;  %v267_v7 = vld [vmem:[%s816_s3 + $0x60] sm:$0xff]  ;;  %v266_v9 = vld [vmem:[%s816_s3 + $0x58] sm:$0xff]  ;;  %v265_v11 = vld [vmem:[%s816_s3 + $0x50] sm:$0xff]  ;;  %s232_s11 = scalar_lea.vmem %s814_s1, %s773_s30  ;;  %s228_s14 = scalar_lea.vmem %s813_s0, %s773_s30 }
   0xe   : > { %533 = vmatprep.subr.mxu0 %v619_v2  ;;  %568 = vmatprep.subr.mxu1 %v619_v2  ;;  %v250_v8 = vld [vmem:[%s815_s2 + $0x60] sm:$0xff]  ;;  %v249_v10 = vld [vmem:[%s815_s2 + $0x58] sm:$0xff]  ;;  %v248_v12 = vld [vmem:[%s815_s2 + $0x50] sm:$0xff]  ;;  %s236_s25 = scalar_lea.vmem %s818_s5, %s773_s30 }
   0xf   : > { %534 = vmatpush3.msra.mxu0 %v269_v3  ;;  %569 = vmatpush3.msra.mxu1 %v252_v4  ;;  %v264_v13 = vld [vmem:[%s816_s3 + $0x48] sm:$0xff]  ;;  %v263_v15 = vld [vmem:[%s816_s3 + $0x40] sm:$0xff]  ;;  %v262_v17 = vld [vmem:[%s816_s3 + $0x38] sm:$0xff] }
  0x10   : > { %535 = vmatprep.subr.mxu0 %v619_v2  ;;  %570 = vmatprep.subr.mxu1 %v619_v2  ;;  %v247_v14 = vld [vmem:[%s815_s2 + $0x48] sm:$0xff]  ;;  %v246_v16 = vld [vmem:[%s815_s2 + $0x40] sm:$0xff]  ;;  %v245_v18 = vld [vmem:[%s815_s2 + $0x38] sm:$0xff] }
  0x11   : > { %536 = vmatpush3.msra.mxu0 %v268_v5  ;;  %571 = vmatpush3.msra.mxu1 %v251_v6  ;;  %v261_v19 = vld [vmem:[%s816_s3 + $0x30] sm:$0xff]  ;;  %v260_v21 = vld [vmem:[%s816_s3 + $0x28] sm:$0xff]  ;;  %v259_v23 = vld [vmem:[%s816_s3 + $0x20] sm:$0xff] }
  0x12   : > { %537 = vmatprep.subr.mxu0 %v619_v2  ;;  %572 = vmatprep.subr.mxu1 %v619_v2  ;;  %v244_v20 = vld [vmem:[%s815_s2 + $0x30] sm:$0xff]  ;;  %v243_v22 = vld [vmem:[%s815_s2 + $0x28] sm:$0xff]  ;;  %v242_v24 = vld [vmem:[%s815_s2 + $0x20] sm:$0xff] }
  0x13   : > { %538 = vmatpush3.msra.mxu0 %v267_v7  ;;  %573 = vmatpush3.msra.mxu1 %v250_v8  ;;  %v258_v25 = vld [vmem:[%s816_s3 + $0x18] sm:$0xff]  ;;  %v257_v27 = vld [vmem:[%s816_s3 + $0x10] sm:$0xff]  ;;  %v256_v29 = vld [vmem:[%s816_s3 + $0x8] sm:$0xff] }
  0x14   : > { %539 = vmatprep.subr.mxu0 %v619_v2  ;;  %574 = vmatprep.subr.mxu1 %v619_v2  ;;  %v241_v26 = vld [vmem:[%s815_s2 + $0x18] sm:$0xff]  ;;  %v240_v28 = vld [vmem:[%s815_s2 + $0x10] sm:$0xff]  ;;  %v239_v30 = vld [vmem:[%s815_s2 + $0x8] sm:$0xff] }
  0x15   : > { %540 = vmatpush3.msra.mxu0 %v266_v9  ;;  %575 = vmatpush3.msra.mxu1 %v249_v10  ;;  %v255_v31 = vld [vmem:[%s816_s3] sm:$0xff] }
  0x16   : > { %541 = vmatprep.subr.mxu0 %v619_v2  ;;  %576 = vmatprep.subr.mxu1 %v619_v2  ;;  %v238_v32 = vld [vmem:[%s815_s2] sm:$0xff] }
  0x17   : > { %542 = vmatpush3.msra.mxu0 %v265_v11  ;;  %577 = vmatpush3.msra.mxu1 %v248_v12  ;;  %v254_v33 = vld [vmem:[%s232_s11] sm:$0xff] }
  0x18   : > { %543 = vmatprep.subr.mxu0 %v619_v2  ;;  %578 = vmatprep.subr.mxu1 %v619_v2  ;;  %v237_v34 = vld [vmem:[%s228_s14] sm:$0xff] }
  0x19   : > { %544 = vmatpush3.msra.mxu0 %v264_v13  ;;  %579 = vmatpush3.msra.mxu1 %v247_v14  ;;  %v494_v37 = vld [vmem:[%s817_s4] ss:$0 sm:$0xff] }
  0x1a   : > { %545 = vmatprep.subr.mxu0 %v619_v2  ;;  %580 = vmatprep.subr.mxu1 %v619_v2 }
  0x1b   : > { %546 = vmatpush3.msra.mxu0 %v263_v15  ;;  %581 = vmatpush3.msra.mxu1 %v246_v16 }
  0x1c   : > { %547 = vmatprep.subr.mxu0 %v619_v2  ;;  %582 = vmatprep.subr.mxu1 %v619_v2 }
  0x1d   : > { %548 = vmatpush3.msra.mxu0 %v262_v17  ;;  %583 = vmatpush3.msra.mxu1 %v245_v18 }
  0x1e   : > { %549 = vmatprep.subr.mxu0 %v619_v2  ;;  %584 = vmatprep.subr.mxu1 %v619_v2 }
  0x1f   : > { %550 = vmatpush3.msra.mxu0 %v261_v19  ;;  %585 = vmatpush3.msra.mxu1 %v244_v20 }
  0x20   : > { %551 = vmatprep.subr.mxu0 %v619_v2  ;;  %586 = vmatprep.subr.mxu1 %v619_v2 }
  0x21   : > { %552 = vmatpush3.msra.mxu0 %v260_v21  ;;  %587 = vmatpush3.msra.mxu1 %v243_v22 }
  0x22   : > { %553 = vmatprep.subr.mxu0 %v619_v2  ;;  %588 = vmatprep.subr.mxu1 %v619_v2 }
  0x23   : > { %554 = vmatpush3.msra.mxu0 %v259_v23  ;;  %589 = vmatpush3.msra.mxu1 %v242_v24 }
  0x24   : > { %555 = vmatprep.subr.mxu0 %v619_v2  ;;  %590 = vmatprep.subr.mxu1 %v619_v2 }
  0x25   : > { %556 = vmatpush3.msra.mxu0 %v258_v25  ;;  %591 = vmatpush3.msra.mxu1 %v241_v26 }
  0x26   : > { %557 = vmatprep.subr.mxu0 %v619_v2  ;;  %592 = vmatprep.subr.mxu1 %v619_v2 }
  0x27   : > { %558 = vmatpush3.msra.mxu0 %v257_v27  ;;  %593 = vmatpush3.msra.mxu1 %v240_v28 }
  0x28   : > { %559 = vmatprep.subr.mxu0 %v619_v2  ;;  %594 = vmatprep.subr.mxu1 %v619_v2 }
  0x29   : > { %560 = vmatpush3.msra.mxu0 %v256_v29  ;;  %595 = vmatpush3.msra.mxu1 %v239_v30 }
  0x2a   : > { %561 = vmatprep.subr.mxu0 %v619_v2  ;;  %596 = vmatprep.subr.mxu1 %v619_v2 }
  0x2b   : > { %562 = vmatpush3.msra.mxu0 %v255_v31  ;;  %563 = vmatprep.mubr.msk.f32.mxu0 %vm620_vm0, %v619_v2 }
  0x2c   : > { %597 = vmatpush3.msra.mxu1 %v238_v32  ;;  %598 = vmatprep.mubr.msk.f32.mxu1 %vm620_vm0, %v619_v2 }
  0x2d   : > { %564 = vmatmul.mubr.f32.vlgmr.msra.gmra.mxu0 %v254_v33  ;;  %599 = vmatmul.mubr.f32.vlgmr.msra.gmra.mxu1 %v237_v34 }
  0xed   : > { %v337_v35 = vpop.f32.mrf.mxu0  ;;  %v407_v36 = vpop.f32.mrf.mxu1 }
  0xee   : > { %v408_v38 = vadd.f32 %v407_v36, %v337_v35 }
  0xef   : > { %v565_v39 = vpop.f32.mrf.mxu0  ;;  %v600_v40 = vpop.f32.mrf.mxu1 }
  0xf0   : > { %v418_v41 = vadd.f32 %v494_v37, %v408_v38 }
  0xf2   : > { %420 = vst.msk [vmem:[%s236_s25] sm:$0xff] %vm419_vm1, %v418_v41 }
  0xf3 PF: > { %s15_s18 = sadd.s32 1, %s617_s18  }
  0xf4   : > { %p12_p4 = scmp.ge.s32.totalorder %s15_s18, 4  }
  0xf6   :  { %14 = sbr.rel (!%p12_p4) target bundleno = 1 (0x1), region = 73 }

</bundles_post_ra>
